<compile_context>
chip_gen: v5e
topology: v5e:2x2
jax: 0.10.0
libtpu: 0.0.40
codegen_flags: <defaults>
</compile_context>

<pallas_src>
import functools

import jax
import jax.numpy as jnp
from jax.experimental import pallas as pl
from jax.experimental.pallas import tpu as pltpu

LN_EPS = 1e-5  # nn.LayerNorm default


def _round_up(x, m):
    return (x + m - 1) // m * m


def _layernorm(h, gamma, beta):
    # var = E[h^2] - mu^2: the two cross-lane reductions are independent.
    mu = jnp.mean(h, axis=-1, keepdims=True)
    msq = jnp.mean(h * h, axis=-1, keepdims=True)
    var = jnp.maximum(msq - mu * mu, 0.0)
    return (h - mu) * jax.lax.rsqrt(var + LN_EPS) * gamma + beta


def actor_kernel(x_ref,
                 w1_ref, b1_ref, g1_ref, be1_ref,
                 w2_ref, b2_ref, g2_ref, be2_ref,
                 w3_ref, b3_ref,
                 out_ref):
    x = x_ref[...]  # (TILE_B, K_pad) bf16

    # shared layer 1: Linear(state_dim, 256) -> LayerNorm(256) -> ReLU
    h1 = jnp.dot(x, w1_ref[...], preferred_element_type=jnp.float32) + b1_ref[...]
    h1 = _layernorm(h1, g1_ref[...], be1_ref[...])
    h1 = jnp.maximum(h1, 0.0)

    # shared layer 2: Linear(256, 128) -> LayerNorm(128) -> ReLU
    h2 = jnp.dot(h1.astype(jnp.bfloat16), w2_ref[...],
                 preferred_element_type=jnp.float32) + b2_ref[...]
    h2 = _layernorm(h2, g2_ref[...], be2_ref[...])
    h2 = jnp.maximum(h2, 0.0)

    # action head: Linear(128, action_dim_pad) -> tanh  (lane-dense 128 store)
    a = jnp.dot(h2.astype(jnp.bfloat16), w3_ref[...],
                preferred_element_type=jnp.float32) + b3_ref[...]
    out_ref[...] = jnp.tanh(a)


@functools.partial(jax.jit, static_argnames=())
def actor_forward(state, params):
    (w1, b1, g1, be1, w2, b2, g2, be2, w3, b3) = params
    B, state_dim = state.shape
    action_dim = w3.shape[1]

    # ----- lane-dense padding ------------------------------------------------
    K_pad = _round_up(state_dim, 128)       # input feature dim
    A_pad = _round_up(action_dim, 128)      # action head output dim

    # batch tiling: sublane-aligned, capped at 256 rows / tile
    Bp8 = _round_up(B, 8)
    TILE_B = min(256, Bp8)
    B_pad = _round_up(Bp8, TILE_B)
    n_tiles = B_pad // TILE_B

    x_p = jnp.pad(state, ((0, B_pad - B), (0, K_pad - state_dim)))
    x_bf = x_p.astype(jnp.bfloat16)

    w1_bf = jnp.pad(w1, ((0, K_pad - state_dim), (0, 0))).astype(jnp.bfloat16)
    w2_bf = w2.astype(jnp.bfloat16)
    w3_bf = jnp.pad(w3, ((0, 0), (0, A_pad - action_dim))).astype(jnp.bfloat16)
    b3_p = jnp.pad(b3, ((0, 0), (0, A_pad - action_dim)))

    # ----- specs -------------------------------------------------------------
    x_spec = pl.BlockSpec((TILE_B, K_pad), lambda i: (i, 0))
    out_spec = pl.BlockSpec((TILE_B, A_pad), lambda i: (i, 0))

    def resident(shape):
        return pl.BlockSpec(shape, lambda i: (0, 0))

    in_specs = [
        x_spec,
        resident((K_pad, 256)), resident((1, 256)), resident((1, 256)), resident((1, 256)),
        resident((256, 128)), resident((1, 128)), resident((1, 128)), resident((1, 128)),
        resident((128, A_pad)), resident((1, A_pad)),
    ]

    # ----- cost estimate -----------------------------------------------------
    flops = 2 * B_pad * (K_pad * 256 + 256 * 128 + 128 * A_pad)
    transcendentals = B_pad * (A_pad + 2)   # tanh + 2 rsqrt per row
    bytes_accessed = (
        x_bf.size * 2
        + (w1_bf.size + w2_bf.size + w3_bf.size) * 2
        + (b1.size + g1.size + be1.size + b2.size + g2.size + be2.size + b3_p.size) * 4
        + B_pad * A_pad * 4
    )
    cost = pl.CostEstimate(flops=flops,
                           transcendentals=transcendentals,
                           bytes_accessed=bytes_accessed)

    out = pl.pallas_call(
        actor_kernel,
        out_shape=jax.ShapeDtypeStruct((B_pad, A_pad), jnp.float32),
        grid=(n_tiles,),
        in_specs=in_specs,
        out_specs=out_spec,
        compiler_params=pltpu.CompilerParams(
            dimension_semantics=("parallel",)),
        cost_estimate=cost,
    )(x_bf, w1_bf, b1, g1, be1, w2_bf, b2, g2, be2, w3_bf, b3_p)

    return out[:B, :action_dim]


def init_actor_params(key, state_dim, action_dim):
    """Deterministic init mimicking PyTorch defaults (uniform +/- 1/sqrt(fan_in))."""
    def linear(key, fan_in, fan_out):
        kw, kb = jax.random.split(key)
        bound = 1.0 / jnp.sqrt(fan_in)
        # stored as [in, out] (transpose of torch's [out, in])
        w = jax.random.uniform(kw, (fan_in, fan_out), jnp.float32, -bound, bound)
        b = jax.random.uniform(kb, (1, fan_out), jnp.float32, -bound, bound)
        return w, b

    k1, k2, k3 = jax.random.split(key, 3)
    w1, b1 = linear(k1, state_dim, 256)
    w2, b2 = linear(k2, 256, 128)
    w3, b3 = linear(k3, 128, action_dim)
    g1, be1 = jnp.ones((1, 256), jnp.float32), jnp.zeros((1, 256), jnp.float32)
    g2, be2 = jnp.ones((1, 128), jnp.float32), jnp.zeros((1, 128), jnp.float32)
    return (w1, b1, g1, be1, w2, b2, g2, be2, w3, b3)


def actor_reference(state, params, matmul_dtype=jnp.bfloat16):
    """Plain-JAX reference with the same bf16-matmul / f32-accumulate recipe."""
    (w1, b1, g1, be1, w2, b2, g2, be2, w3, b3) = params

    def mm(x, w):
        return jnp.dot(x.astype(matmul_dtype), w.astype(matmul_dtype),
                       preferred_element_type=jnp.float32)

    h = _layernorm(mm(state, w1) + b1, g1, be1)
    h = jnp.maximum(h, 0.0)
    h = _layernorm(mm(h, w2) + b2, g2, be2)
    h = jnp.maximum(h, 0.0)
    return jnp.tanh(mm(h, w3) + b3)


if __name__ == "__main__":
    state_dim, action_dim, batch = 32, 8, 8

    key = jax.random.PRNGKey(0)
    k_params, k_state = jax.random.split(key)
    params = init_actor_params(k_params, state_dim, action_dim)
    state = jax.random.normal(k_state, (batch, state_dim), jnp.float32)

    out = actor_forward(state, params)
    jax.block_until_ready(out)
    assert out.shape == (batch, action_dim)

    # Matches a plain-JAX version of the same bf16-matmul recipe tightly...
    ref_bf16 = actor_reference(state, params, matmul_dtype=jnp.bfloat16)
    assert jnp.allclose(out, ref_bf16, atol=2e-3, rtol=2e-3)
    # ...and the original f32 semantics within bf16 matmul tolerance.
    ref_f32 = actor_reference(state, params, matmul_dtype=jnp.float32)
    assert jnp.allclose(out, ref_f32, atol=5e-2, rtol=5e-2)

    print("KERNEL_OK")
</pallas_src>

<mosaic_0001>
module attributes {stable_mosaic.version = 11 : i64} {
  func.func @actor_kernel(%arg0: i32, %arg1: memref<8x128xbf16, #tpu.memory_space<vmem>>, %arg2: memref<128x256xbf16, #tpu.memory_space<vmem>>, %arg3: memref<1x256xf32, #tpu.memory_space<vmem>>, %arg4: memref<1x256xf32, #tpu.memory_space<vmem>>, %arg5: memref<1x256xf32, #tpu.memory_space<vmem>>, %arg6: memref<256x128xbf16, #tpu.memory_space<vmem>>, %arg7: memref<1x128xf32, #tpu.memory_space<vmem>>, %arg8: memref<1x128xf32, #tpu.memory_space<vmem>>, %arg9: memref<1x128xf32, #tpu.memory_space<vmem>>, %arg10: memref<128x128xbf16, #tpu.memory_space<vmem>>, %arg11: memref<1x128xf32, #tpu.memory_space<vmem>>, %arg12: memref<8x128xf32, #tpu.memory_space<vmem>>) attributes {dimension_semantics = [#tpu.dimension_semantics<parallel>], iteration_bounds = array<i64: 1>, scalar_prefetch = 0 : i64, scratch_operands = 0 : i64, tpu.core_type = #tpu.core_type<tc>, window_params = [{transform_indices = @transform_0, window_bounds = array<i64: 8, 128>}, {pipeline_mode = #tpu.pipeline_mode<synchronous>, transform_indices = @transform_1, window_bounds = array<i64: 128, 256>}, {pipeline_mode = #tpu.pipeline_mode<synchronous>, transform_indices = @transform_2, window_bounds = array<i64: 1, 256>}, {pipeline_mode = #tpu.pipeline_mode<synchronous>, transform_indices = @transform_3, window_bounds = array<i64: 1, 256>}, {pipeline_mode = #tpu.pipeline_mode<synchronous>, transform_indices = @transform_4, window_bounds = array<i64: 1, 256>}, {pipeline_mode = #tpu.pipeline_mode<synchronous>, transform_indices = @transform_5, window_bounds = array<i64: 256, 128>}, {pipeline_mode = #tpu.pipeline_mode<synchronous>, transform_indices = @transform_6, window_bounds = array<i64: 1, 128>}, {pipeline_mode = #tpu.pipeline_mode<synchronous>, transform_indices = @transform_7, window_bounds = array<i64: 1, 128>}, {pipeline_mode = #tpu.pipeline_mode<synchronous>, transform_indices = @transform_8, window_bounds = array<i64: 1, 128>}, {pipeline_mode = #tpu.pipeline_mode<synchronous>, transform_indices = @transform_9, window_bounds = array<i64: 128, 128>}, {pipeline_mode = #tpu.pipeline_mode<synchronous>, transform_indices = @transform_10, window_bounds = array<i64: 1, 128>}, {transform_indices = @transform_11, window_bounds = array<i64: 8, 128>}]} {
    %c0 = arith.constant 0 : index
    %c0_0 = arith.constant 0 : index
    %0 = vector.load %arg1[%c0, %c0_0] : memref<8x128xbf16, #tpu.memory_space<vmem>>, vector<8x128xbf16>
    %c0_1 = arith.constant 0 : index
    %c0_2 = arith.constant 0 : index
    %1 = vector.load %arg2[%c0_1, %c0_2] : memref<128x256xbf16, #tpu.memory_space<vmem>>, vector<128x256xbf16>
    %cst = arith.constant dense<0.000000e+00> : vector<8x256xf32>
    %2 = tpu.matmul %0, %1, %cst {dimension_numbers = #tpu.dot_dimension_numbers<[1], [0], [0], [1], [0, 0, 1, 1], [], []>} : vector<8x128xbf16>, vector<128x256xbf16>, vector<8x256xf32> -> vector<8x256xf32>
    %c0_3 = arith.constant 0 : index
    %c0_4 = arith.constant 0 : index
    %3 = vector.load %arg3[%c0_3, %c0_4] : memref<1x256xf32, #tpu.memory_space<vmem>>, vector<1x256xf32>
    %4 = vector.broadcast %3 : vector<1x256xf32> to vector<8x256xf32>
    %5 = arith.addf %2, %4 : vector<8x256xf32>
    %c0_5 = arith.constant 0 : index
    %c0_6 = arith.constant 0 : index
    %6 = vector.load %arg4[%c0_5, %c0_6] : memref<1x256xf32, #tpu.memory_space<vmem>>, vector<1x256xf32>
    %c0_7 = arith.constant 0 : index
    %c0_8 = arith.constant 0 : index
    %7 = vector.load %arg5[%c0_7, %c0_8] : memref<1x256xf32, #tpu.memory_space<vmem>>, vector<1x256xf32>
    %cst_9 = arith.constant dense<0.000000e+00> : vector<8xf32>
    %8 = vector.multi_reduction <add>, %5, %cst_9 [1] : vector<8x256xf32> to vector<8xf32>
    %9 = vector.shape_cast %8 : vector<8xf32> to vector<8x1xf32>
    %cst_10 = arith.constant 2.560000e+02 : f32
    %10 = vector.broadcast %cst_10 : f32 to vector<8x1xf32>
    %11 = arith.divf %9, %10 : vector<8x1xf32>
    %12 = arith.mulf %5, %5 : vector<8x256xf32>
    %cst_11 = arith.constant dense<0.000000e+00> : vector<8xf32>
    %13 = vector.multi_reduction <add>, %12, %cst_11 [1] : vector<8x256xf32> to vector<8xf32>
    %14 = vector.shape_cast %13 : vector<8xf32> to vector<8x1xf32>
    %cst_12 = arith.constant 2.560000e+02 : f32
    %15 = vector.broadcast %cst_12 : f32 to vector<8x1xf32>
    %16 = arith.divf %14, %15 : vector<8x1xf32>
    %17 = arith.mulf %11, %11 : vector<8x1xf32>
    %18 = arith.subf %16, %17 : vector<8x1xf32>
    %cst_13 = arith.constant 0.000000e+00 : f32
    %19 = vector.broadcast %cst_13 : f32 to vector<8x1xf32>
    %20 = arith.maximumf %18, %19 : vector<8x1xf32>
    %21 = vector.broadcast %11 : vector<8x1xf32> to vector<8x256xf32>
    %22 = arith.subf %5, %21 : vector<8x256xf32>
    %cst_14 = arith.constant 9.99999974E-6 : f32
    %23 = vector.broadcast %cst_14 : f32 to vector<8x1xf32>
    %24 = arith.addf %20, %23 : vector<8x1xf32>
    %25 = math.rsqrt %24 : vector<8x1xf32>
    %26 = vector.broadcast %25 : vector<8x1xf32> to vector<8x256xf32>
    %27 = arith.mulf %22, %26 : vector<8x256xf32>
    %28 = vector.broadcast %6 : vector<1x256xf32> to vector<8x256xf32>
    %29 = arith.mulf %27, %28 : vector<8x256xf32>
    %30 = vector.broadcast %7 : vector<1x256xf32> to vector<8x256xf32>
    %31 = arith.addf %29, %30 : vector<8x256xf32>
    %cst_15 = arith.constant 0.000000e+00 : f32
    %32 = vector.broadcast %cst_15 : f32 to vector<8x256xf32>
    %33 = arith.maximumf %31, %32 : vector<8x256xf32>
    %34 = arith.truncf %33 : vector<8x256xf32> to vector<8x256xbf16>
    %c0_16 = arith.constant 0 : index
    %c0_17 = arith.constant 0 : index
    %35 = vector.load %arg6[%c0_16, %c0_17] : memref<256x128xbf16, #tpu.memory_space<vmem>>, vector<256x128xbf16>
    %cst_18 = arith.constant dense<0.000000e+00> : vector<8x128xf32>
    %36 = tpu.matmul %34, %35, %cst_18 {dimension_numbers = #tpu.dot_dimension_numbers<[1], [0], [0], [1], [0, 0, 1, 1], [], []>} : vector<8x256xbf16>, vector<256x128xbf16>, vector<8x128xf32> -> vector<8x128xf32>
    %c0_19 = arith.constant 0 : index
    %c0_20 = arith.constant 0 : index
    %37 = vector.load %arg7[%c0_19, %c0_20] : memref<1x128xf32, #tpu.memory_space<vmem>>, vector<1x128xf32>
    %38 = vector.broadcast %37 : vector<1x128xf32> to vector<8x128xf32>
    %39 = arith.addf %36, %38 : vector<8x128xf32>
    %c0_21 = arith.constant 0 : index
    %c0_22 = arith.constant 0 : index
    %40 = vector.load %arg8[%c0_21, %c0_22] : memref<1x128xf32, #tpu.memory_space<vmem>>, vector<1x128xf32>
    %c0_23 = arith.constant 0 : index
    %c0_24 = arith.constant 0 : index
    %41 = vector.load %arg9[%c0_23, %c0_24] : memref<1x128xf32, #tpu.memory_space<vmem>>, vector<1x128xf32>
    %cst_25 = arith.constant dense<0.000000e+00> : vector<8xf32>
    %42 = vector.multi_reduction <add>, %39, %cst_25 [1] : vector<8x128xf32> to vector<8xf32>
    %43 = vector.shape_cast %42 : vector<8xf32> to vector<8x1xf32>
    %cst_26 = arith.constant 1.280000e+02 : f32
    %44 = vector.broadcast %cst_26 : f32 to vector<8x1xf32>
    %45 = arith.divf %43, %44 : vector<8x1xf32>
    %46 = arith.mulf %39, %39 : vector<8x128xf32>
    %cst_27 = arith.constant dense<0.000000e+00> : vector<8xf32>
    %47 = vector.multi_reduction <add>, %46, %cst_27 [1] : vector<8x128xf32> to vector<8xf32>
    %48 = vector.shape_cast %47 : vector<8xf32> to vector<8x1xf32>
    %cst_28 = arith.constant 1.280000e+02 : f32
    %49 = vector.broadcast %cst_28 : f32 to vector<8x1xf32>
    %50 = arith.divf %48, %49 : vector<8x1xf32>
    %51 = arith.mulf %45, %45 : vector<8x1xf32>
    %52 = arith.subf %50, %51 : vector<8x1xf32>
    %cst_29 = arith.constant 0.000000e+00 : f32
    %53 = vector.broadcast %cst_29 : f32 to vector<8x1xf32>
    %54 = arith.maximumf %52, %53 : vector<8x1xf32>
    %55 = vector.broadcast %45 : vector<8x1xf32> to vector<8x128xf32>
    %56 = arith.subf %39, %55 : vector<8x128xf32>
    %cst_30 = arith.constant 9.99999974E-6 : f32
    %57 = vector.broadcast %cst_30 : f32 to vector<8x1xf32>
    %58 = arith.addf %54, %57 : vector<8x1xf32>
    %59 = math.rsqrt %58 : vector<8x1xf32>
    %60 = vector.broadcast %59 : vector<8x1xf32> to vector<8x128xf32>
    %61 = arith.mulf %56, %60 : vector<8x128xf32>
    %62 = vector.broadcast %40 : vector<1x128xf32> to vector<8x128xf32>
    %63 = arith.mulf %61, %62 : vector<8x128xf32>
    %64 = vector.broadcast %41 : vector<1x128xf32> to vector<8x128xf32>
    %65 = arith.addf %63, %64 : vector<8x128xf32>
    %cst_31 = arith.constant 0.000000e+00 : f32
    %66 = vector.broadcast %cst_31 : f32 to vector<8x128xf32>
    %67 = arith.maximumf %65, %66 : vector<8x128xf32>
    %68 = arith.truncf %67 : vector<8x128xf32> to vector<8x128xbf16>
    %c0_32 = arith.constant 0 : index
    %c0_33 = arith.constant 0 : index
    %69 = vector.load %arg10[%c0_32, %c0_33] : memref<128x128xbf16, #tpu.memory_space<vmem>>, vector<128x128xbf16>
    %cst_34 = arith.constant dense<0.000000e+00> : vector<8x128xf32>
    %70 = tpu.matmul %68, %69, %cst_34 {dimension_numbers = #tpu.dot_dimension_numbers<[1], [0], [0], [1], [0, 0, 1, 1], [], []>} : vector<8x128xbf16>, vector<128x128xbf16>, vector<8x128xf32> -> vector<8x128xf32>
    %c0_35 = arith.constant 0 : index
    %c0_36 = arith.constant 0 : index
    %71 = vector.load %arg11[%c0_35, %c0_36] : memref<1x128xf32, #tpu.memory_space<vmem>>, vector<1x128xf32>
    %72 = vector.broadcast %71 : vector<1x128xf32> to vector<8x128xf32>
    %73 = arith.addf %70, %72 : vector<8x128xf32>
    %74 = math.tanh %73 : vector<8x128xf32>
    %c0_37 = arith.constant 0 : index
    %c0_38 = arith.constant 0 : index
    %75 = vector.load %arg12[%c0_37, %c0_38] : memref<8x128xf32, #tpu.memory_space<vmem>>, vector<8x128xf32>
    tpu.vector_store %arg12[%c0_37, %c0_38], %74 {strides = array<i32>} : memref<8x128xf32, #tpu.memory_space<vmem>>, vector<8x128xf32>,
    return
  }
  func.func @transform_0(%arg0: i32) -> (i32, i32) {
    %c0_i32 = arith.constant 0 : i32
    %c0_i32_0 = arith.constant 0 : i32
    return %arg0, %c0_i32 : i32, i32
  }
  func.func @transform_1(%arg0: i32) -> (i32, i32) {
    %c0_i32 = arith.constant 0 : i32
    %c0_i32_0 = arith.constant 0 : i32
    %c0_i32_1 = arith.constant 0 : i32
    return %c0_i32, %c0_i32_0 : i32, i32
  }
  func.func @transform_2(%arg0: i32) -> (i32, i32) {
    %c0_i32 = arith.constant 0 : i32
    %c0_i32_0 = arith.constant 0 : i32
    %c0_i32_1 = arith.constant 0 : i32
    return %c0_i32, %c0_i32_0 : i32, i32
  }
  func.func @transform_3(%arg0: i32) -> (i32, i32) {
    %c0_i32 = arith.constant 0 : i32
    %c0_i32_0 = arith.constant 0 : i32
    %c0_i32_1 = arith.constant 0 : i32
    return %c0_i32, %c0_i32_0 : i32, i32
  }
  func.func @transform_4(%arg0: i32) -> (i32, i32) {
    %c0_i32 = arith.constant 0 : i32
    %c0_i32_0 = arith.constant 0 : i32
    %c0_i32_1 = arith.constant 0 : i32
    return %c0_i32, %c0_i32_0 : i32, i32
  }
  func.func @transform_5(%arg0: i32) -> (i32, i32) {
    %c0_i32 = arith.constant 0 : i32
    %c0_i32_0 = arith.constant 0 : i32
    %c0_i32_1 = arith.constant 0 : i32
    return %c0_i32, %c0_i32_0 : i32, i32
  }
  func.func @transform_6(%arg0: i32) -> (i32, i32) {
    %c0_i32 = arith.constant 0 : i32
    %c0_i32_0 = arith.constant 0 : i32
    %c0_i32_1 = arith.constant 0 : i32
    return %c0_i32, %c0_i32_0 : i32, i32
  }
  func.func @transform_7(%arg0: i32) -> (i32, i32) {
    %c0_i32 = arith.constant 0 : i32
    %c0_i32_0 = arith.constant 0 : i32
    %c0_i32_1 = arith.constant 0 : i32
    return %c0_i32, %c0_i32_0 : i32, i32
  }
  func.func @transform_8(%arg0: i32) -> (i32, i32) {
    %c0_i32 = arith.constant 0 : i32
    %c0_i32_0 = arith.constant 0 : i32
    %c0_i32_1 = arith.constant 0 : i32
    return %c0_i32, %c0_i32_0 : i32, i32
  }
  func.func @transform_9(%arg0: i32) -> (i32, i32) {
    %c0_i32 = arith.constant 0 : i32
    %c0_i32_0 = arith.constant 0 : i32
    %c0_i32_1 = arith.constant 0 : i32
    return %c0_i32, %c0_i32_0 : i32, i32
  }
  func.func @transform_10(%arg0: i32) -> (i32, i32) {
    %c0_i32 = arith.constant 0 : i32
    %c0_i32_0 = arith.constant 0 : i32
    %c0_i32_1 = arith.constant 0 : i32
    return %c0_i32, %c0_i32_0 : i32, i32
  }
  func.func @transform_11(%arg0: i32) -> (i32, i32) {
    %c0_i32 = arith.constant 0 : i32
    %c0_i32_0 = arith.constant 0 : i32
    return %arg0, %c0_i32 : i32, i32
  }
}

</mosaic_0001>

<bundles_post_ra>
// kernel: actor_forward.1
= control target key start
LH: loop header
LB: loop body
LE: loop exit
PB: predicated region body
PF: predicated region fallthrough
CT: control target
= control target key end

     0   :  { %s1035_s0 = inlined_call_operand.vmem [shape: bf16[8,128], index: 0, kind: input, shape index: {}]   ;;  %s1036_s1 = inlined_call_operand.vmem [shape: bf16[128,256], index: 1, kind: input, shape index: {}]   ;;  %s1037_s2 = inlined_call_operand.vmem [shape: f32[1,256], index: 2, kind: input, shape index: {}]   ;;  %s1038_s3 = inlined_call_operand.vmem [shape: f32[1,256], index: 3, kind: input, shape index: {}]   ;;  %s1039_s4 = inlined_call_operand.vmem [shape: f32[1,256], index: 4, kind: input, shape index: {}]   ;;  %s1040_s5 = inlined_call_operand.vmem [shape: bf16[256,128], index: 5, kind: input, shape index: {}]   ;;  %s1041_s6 = inlined_call_operand.vmem [shape: f32[1,128], index: 6, kind: input, shape index: {}]   ;;  %s1042_s7 = inlined_call_operand.vmem [shape: f32[1,128], index: 7, kind: input, shape index: {}]   ;;  %s1043_s8 = inlined_call_operand.vmem [shape: f32[1,128], index: 8, kind: input, shape index: {}]   ;;  %s1044_s9 = inlined_call_operand.vmem [shape: bf16[128,128], index: 9, kind: input, shape index: {}]   ;;  %s1045_s10 = inlined_call_operand.vmem [shape: f32[1,128], index: 10, kind: input, shape index: {}]   ;;  %s1046_s11 = inlined_call_operand.hbm [shape: f32[8,128], index: 11, kind: output, shape index: {}]  }
   0x1   :  { %v580_v0 = vld [vmem:[%s1036_s1 + $0x70] sm:$0xf]  ;;  %v697_v1 = vld [vmem:[%s1036_s1 + $0x74] sm:$0xf0]  ;;  %v696_v2 = vld [vmem:[%s1036_s1 + $0x74] sm:$0xf] }
   0x2   :  { %v581_v3 = vor.u32 %v697_v1, %v580_v0  ;;  %v582_v4 = vld [vmem:[%s1036_s1 + $0x78] sm:$0xf0]  ;;  %v572_v5 = vld [vmem:[%s1036_s1 + $0x60] sm:$0xf]  ;;  %v695_v6 = vld [vmem:[%s1036_s1 + $0x64] sm:$0xf0] }
   0x3   :  { %v585_v7 = vor.u32 %v696_v2, %v582_v4  ;;  %v694_v8 = vld [vmem:[%s1036_s1 + $0x64] sm:$0xf]  ;;  %v574_v9 = vld [vmem:[%s1036_s1 + $0x68] sm:$0xf0]  ;;  %v573_v10 = vor.u32 %v695_v6, %v572_v5  ;;  %v564_v12 = vld [vmem:[%s1036_s1 + $0x50] sm:$0xf] }
   0x4   :  { %142 = vmatpush.bf16.msra.mxu0 %v581_v3  ;;  %v577_v11 = vor.u32 %v694_v8, %v574_v9  ;;  %v693_v13 = vld [vmem:[%s1036_s1 + $0x54] sm:$0xf0]  ;;  %v692_v14 = vld [vmem:[%s1036_s1 + $0x54] sm:$0xf]  ;;  %v566_v15 = vld [vmem:[%s1036_s1 + $0x58] sm:$0xf0] }
   0x5   :  { %155 = vmatpush.bf16.msra.mxu1 %v585_v7  ;;  %v565_v16 = vor.u32 %v693_v13, %v564_v12  ;;  %v569_v17 = vor.u32 %v692_v14, %v566_v15  ;;  %v556_v18 = vld [vmem:[%s1036_s1 + $0x40] sm:$0xf]  ;;  %v691_v19 = vld [vmem:[%s1036_s1 + $0x44] sm:$0xf0]  ;;  %v690_v20 = vld [vmem:[%s1036_s1 + $0x44] sm:$0xf] }
   0x6   :  { %v558_v21 = vld [vmem:[%s1036_s1 + $0x48] sm:$0xf0]  ;;  %v557_v22 = vor.u32 %v691_v19, %v556_v18  ;;  %v548_v23 = vld [vmem:[%s1036_s1 + $0x30] sm:$0xf]  ;;  %v689_v25 = vld [vmem:[%s1036_s1 + $0x34] sm:$0xf0] }
   0x7   :  { %v561_v24 = vor.u32 %v690_v20, %v558_v21  ;;  %v688_v26 = vld [vmem:[%s1036_s1 + $0x34] sm:$0xf]  ;;  %v550_v27 = vld [vmem:[%s1036_s1 + $0x38] sm:$0xf0] }
   0x8   :  { %143 = vmatpush.bf16.msra.mxu0 %v573_v10 }
   0x9   :  { %156 = vmatpush.bf16.msra.mxu1 %v577_v11 }
   0xc   :  { %144 = vmatpush.bf16.msra.mxu0 %v565_v16 }
   0xd   :  { %157 = vmatpush.bf16.msra.mxu1 %v569_v17 }
   0xe   :  { %16 = vsyncpa [#allocation3], 0  ;;  %v549_v28 = vor.u32 %v689_v25, %v548_v23  ;;  %v553_v29 = vor.u32 %v688_v26, %v550_v27  ;;  %v540_v30 = vld [vmem:[%s1036_s1 + $0x20] sm:$0xf]  ;;  %v687_v31 = vld [vmem:[%s1036_s1 + $0x24] sm:$0xf0] }
   0xf   :  { %v686_v32 = vld [vmem:[%s1036_s1 + $0x24] sm:$0xf]  ;;  %v542_v33 = vld [vmem:[%s1036_s1 + $0x28] sm:$0xf0]  ;;  %v541_v34 = vor.u32 %v687_v31, %v540_v30  ;;  %v532_v36 = vld [vmem:[%s1036_s1 + $0x10] sm:$0xf] }
  0x10   :  { %145 = vmatpush.bf16.msra.mxu0 %v557_v22  ;;  %v545_v35 = vor.u32 %v686_v32, %v542_v33  ;;  %v685_v37 = vld [vmem:[%s1036_s1 + $0x14] sm:$0xf0]  ;;  %v684_v38 = vld [vmem:[%s1036_s1 + $0x14] sm:$0xf]  ;;  %v534_v39 = vld [vmem:[%s1036_s1 + $0x18] sm:$0xf0] }
  0x11   :  { %158 = vmatpush.bf16.msra.mxu1 %v561_v24  ;;  %v533_v40 = vor.u32 %v685_v37, %v532_v36  ;;  %v537_v41 = vor.u32 %v684_v38, %v534_v39  ;;  %v524_v42 = vld [vmem:[%s1036_s1] sm:$0xf]  ;;  %v683_v43 = vld [vmem:[%s1036_s1 + $0x4] sm:$0xf0]  ;;  %v682_v44 = vld [vmem:[%s1036_s1 + $0x4] sm:$0xf] }
  0x12   :  { %v526_v45 = vld [vmem:[%s1036_s1 + $0x8] sm:$0xf0]  ;;  %v525_v46 = vor.u32 %v683_v43, %v524_v42  ;;  %v39_v48 = vld [vmem:[%s1035_s0] sm:$0xf]  ;;  %v765_v62 = vmov 256.0   ;;  %v705_v63 = vld [vmem:[%s1040_s5 + $0x38] sm:$0xff] }
  0x13   :  { %v529_v47 = vor.u32 %v682_v44, %v526_v45  ;;  %v56_v49 = vld [vmem:[%s1037_s2] sm:$0x3]  ;;  %729 = vrcp.f32 %v765_v62  ;;  %v713_v0 = vld [vmem:[%s1040_s5 + $0x78] sm:$0xff]  ;;  %355 = vmatpush.bf16.msra.mxu2 %v705_v63  ;;  %v704_v2 = vld [vmem:[%s1040_s5 + $0x30] sm:$0xff]  ;;  %v766_v62 = vmov 128.0   ;;  %s767_s17 = smov [#allocation2]  }
  0x14   :  { %146 = vmatpush.bf16.msra.mxu0 %v549_v28  ;;  %v58_v50 = vperm.slane %v56_v49, 0  ;;  %v59_v51 = vperm.slane %v56_v49, 1  ;;  %368 = vmatpush.bf16.msra.mxu3 %v713_v0  ;;  %v712_v3 = vld [vmem:[%s1040_s5 + $0x70] sm:$0xff]  ;;  %v703_v5 = vld [vmem:[%s1040_s5 + $0x28] sm:$0xff]  ;;  %v702_v8 = vld [vmem:[%s1040_s5 + $0x20] sm:$0xff] }
  0x15   :  { %159 = vmatpush.bf16.msra.mxu1 %v553_v29  ;;  %v711_v6 = vld [vmem:[%s1040_s5 + $0x68] sm:$0xff]  ;;  %v710_v9 = vld [vmem:[%s1040_s5 + $0x60] sm:$0xff]  ;;  %v701_v11 = vld [vmem:[%s1040_s5 + $0x18] sm:$0xff] }
  0x16   :  { %v709_v12 = vld [vmem:[%s1040_s5 + $0x58] sm:$0xff]  ;;  %v700_v14 = vld [vmem:[%s1040_s5 + $0x10] sm:$0xff]  ;;  %v699_v18 = vld [vmem:[%s1040_s5 + $0x8] sm:$0xff] }
  0x17   :  { %356 = vmatpush.bf16.msra.mxu2 %v704_v2  ;;  %v708_v15 = vld [vmem:[%s1040_s5 + $0x50] sm:$0xff]  ;;  %v707_v19 = vld [vmem:[%s1040_s5 + $0x48] sm:$0xff]  ;;  %v698_v21 = vld [vmem:[%s1040_s5] sm:$0xff] }
  0x18   :  { %147 = vmatpush.bf16.msra.mxu0 %v541_v34  ;;  %369 = vmatpush.bf16.msra.mxu3 %v712_v3  ;;  %v706_v22 = vld [vmem:[%s1040_s5 + $0x40] sm:$0xff]  ;;  %v721_v63 = vld [vmem:[%s1044_s9 + $0x38] sm:$0xff]  ;;  %v719_v3 = vld [vmem:[%s1044_s9 + $0x28] sm:$0xff] }
  0x19   :  { %160 = vmatpush.bf16.msra.mxu1 %v545_v35  ;;  %v730_v1 = vpop.eup %729  ;;  %v168_v34 = vld [vmem:[%s1038_s3] sm:$0x3]  ;;  %s513_s3 = sshll.u32 %s1046_s11, 4  ;;  %s514_s3 = int_to_ptr.hbm [resolvable:$true] %s513_s3 }
  0x1a   :  { %v174_v4 = vmul.f32 256.0, %v730_v1  ;;  %vm178_vm0 = vweird.f32 %v730_v1  ;;  %v169_v35 = vld [vmem:[%s1039_s4] sm:$0x3]  ;;  %v206_v39 = vperm.slane %v168_v34, 0 }
  0x1b   :  { %357 = vmatpush.bf16.msra.mxu2 %v703_v5  ;;  %v213_v43 = vperm.slane %v169_v35, 0  ;;  %v214_v45 = vperm.slane %v169_v35, 1  ;;  %v718_v5 = vld [vmem:[%s1044_s9 + $0x20] sm:$0xff] }
  0x1c   :  { %148 = vmatpush.bf16.msra.mxu0 %v533_v40  ;;  %v175_v7 = vsub.f32 1.0, %v174_v4  ;;  %370 = vmatpush.bf16.msra.mxu3 %v711_v6  ;;  %v207_v40 = vperm.slane %v168_v34, 1 }
  0x1d   :  { %161 = vmatpush.bf16.msra.mxu1 %v537_v41 }
  0x1e   :  { %v176_v10 = vmul.f32 %v730_v1, %v175_v7  ;;  %v717_v7 = vld [vmem:[%s1044_s9 + $0x18] sm:$0xff] }
  0x1f   :  { %358 = vmatpush.bf16.msra.mxu2 %v702_v8 }
  0x20   :  { %149 = vmatpush.bf16.msra.mxu0 %v525_v46  ;;  %371 = vmatpush.bf16.msra.mxu3 %v710_v9  ;;  %v177_v13 = vadd.f32 %v730_v1, %v176_v10  ;;  %v716_v10 = vld [vmem:[%s1044_s9 + $0x10] sm:$0xff] }
  0x21   :  { %162 = vmatpush.bf16.msra.mxu1 %v529_v47 }
  0x22   :  { %v179_v17 = vsel %vm178_vm0, %v730_v1, %v177_v13  ;;  %v720_v1 = vld [vmem:[%s1044_s9 + $0x30] sm:$0xff] }
  0x23   :  { %150 = vmatmul.bf16.vlgmr.msra.gmra.mxu0 %v39_v48  ;;  %359 = vmatpush.bf16.msra.mxu2 %v701_v11 }
  0x24   :  { %163 = vmatmul.bf16.vlgmr.msra.gmra.mxu1 %v39_v48  ;;  %372 = vmatpush.bf16.msra.mxu3 %v709_v12  ;;  %v715_v12 = vld [vmem:[%s1044_s9 + $0x8] sm:$0xff] }
  0x25   :  { %491 = vmatpush.bf16.msrb.mxu0 %v721_v63 }
  0x27   :  { %360 = vmatpush.bf16.msra.mxu2 %v700_v14  ;;  %v714_v14 = vld [vmem:[%s1044_s9] sm:$0xff] }
  0x28   :  { %373 = vmatpush.bf16.msra.mxu3 %v708_v15 }
  0x29   :  { %492 = vmatpush.bf16.msrb.mxu0 %v720_v1 }
  0x2b   :  { %361 = vmatpush.bf16.msra.mxu2 %v699_v18 }
  0x2c   :  { %374 = vmatpush.bf16.msra.mxu3 %v707_v19 }
  0x2d   :  { %493 = vmatpush.bf16.msrb.mxu0 %v719_v3 }
  0x2f   :  { %362 = vmatpush.bf16.msra.mxu2 %v698_v21 }
  0x30   :  { %375 = vmatpush.bf16.msra.mxu3 %v706_v22 }
  0x31   :  { %494 = vmatpush.bf16.msrb.mxu0 %v718_v5 }
  0x35   :  { %495 = vmatpush.bf16.msrb.mxu0 %v717_v7 }
  0x39   :  { %496 = vmatpush.bf16.msrb.mxu0 %v716_v10 }
  0x3d   :  { %497 = vmatpush.bf16.msrb.mxu0 %v715_v12 }
  0x41   :  { %498 = vmatpush.bf16.msrb.mxu0 %v714_v14 }
  0xa0   :  { %v151_v52 = vpop.f32.mrf.mxu0 }
  0xa1   :  { %v930_v53 = vadd.f32 %v151_v52, %v58_v50  ;;  %v164_v54 = vpop.f32.mrf.mxu1 }
  0xa2   :  { %v932_v55 = vadd.f32 %v164_v54, %v59_v51 }
  0xa3   :  { %v181_v58 = vmul.f32 %v930_v53, %v930_v53 }
  0xa4   :  { %v170_v56 = vadd.f32 %v932_v55, %v930_v53  ;;  %v182_v59 = vmul.f32 %v932_v55, %v932_v55 }
  0xa6   :  { %171 = vadd.xlane.f32.xlu0 %v170_v56  ;;  %v183_v61 = vadd.f32 %v182_v59, %v181_v58 }
  0xa8   :  { %v153_v57 = vpop.f32.mrf.mxu0 }
  0xa9   :  { %v166_v60 = vpop.f32.mrf.mxu1 }
  0xae   :  { %184 = vadd.xlane.f32.xlu0 %v183_v61 }
 0x119   :  { %v172_v16 = vpop.xlane.xlu0 %171 }
 0x11a   :  { %v180_v20 = vmul.f32 %v179_v17, %v172_v16 }
 0x11c   :  { %v187_v24 = vmul.f32 %v180_v20, %v180_v20  ;;  %v190_v37 = vsub.f32 %v930_v53, %v180_v20  ;;  %v191_v38 = vsub.f32 %v932_v55, %v180_v20  ;;  %v725_v53 = vld [vmem:[%s1041_s6] ss:$0 sm:$0xff] }
 0x121   :  { %v185_v23 = vpop.xlane.xlu0 %184 }
 0x122   :  { %v186_v25 = vmul.f32 %v185_v23, %v179_v17 }
 0x124   :  { %v188_v26 = vsub.f32 %v186_v25, %v187_v24 }
 0x126   :  { %v189_v27 = vmax.f32 %v188_v26, 0.0 }
 0x128   :  { %v192_v28 = vadd.f32 1e-05, %v189_v27 }
 0x12a   :  { %731 = vrsqrt.f32 %v192_v28  ;;  %vm199_vm2 = vweird.f32 %v192_v28 }
 0x12b   :  { %733 = vrcp.f32 %v766_v62 }
 0x130   :  { %v732_v29 = vpop.eup %731 }
 0x131   :  { %v194_v30 = vmul.f32 %v732_v29, %v192_v28  ;;  %vm200_vm1 = vweird.f32 %v732_v29  ;;  %v734_v0 = vpop.eup %733  ;;  %v726_v28 = vld [vmem:[%s1042_s7] ss:$0 sm:$0xff]  ;;  %s511_s7 = sshll.u32 %s767_s17, 4  ;;  %s512_s7 = int_to_ptr.vmem [resolvable:$true] %s511_s7 }
 0x132   :  { %vm201_vm3 = vmor %vm199_vm2, %vm200_vm1  ;;  %v386_v2 = vmul.f32 128.0, %v734_v0  ;;  %vm390_vm4 = vweird.f32 %v734_v0 }
 0x133   :  { %v195_v31 = vmul.f32 %v732_v29, %v194_v30 }
 0x134   :  { %v387_v4 = vsub.f32 1.0, %v386_v2 }
 0x135   :  { %v196_v32 = vmul.f32 0.5, %v195_v31  ;;  %v727_v31 = vld [vmem:[%s1043_s8] ss:$0 sm:$0xff] }
 0x136   :  { %v388_v6 = vmul.f32 %v734_v0, %v387_v4 }
 0x137   :  { %v197_v33 = vsub.f32 1.5, %v196_v32 }
 0x138   :  { %v389_v8 = vadd.f32 %v734_v0, %v388_v6 }
 0x139   :  { %v198_v36 = vmul.f32 %v732_v29, %v197_v33 }
 0x13a   :  { %v391_v11 = vsel %vm390_vm4, %v734_v0, %v389_v8 }
 0x13b   :  { %v202_v41 = vsel %vm201_vm3, %v732_v29, %v198_v36  ;;  %v728_v36 = vld [vmem:[%s1045_s10] ss:$0 sm:$0xff] }
 0x13c   :  { %v203_v42 = vmul.f32 %v202_v41, %v190_v37  ;;  %v204_v44 = vmul.f32 %v202_v41, %v191_v38 }
 0x13e   :  { %v210_v46 = vmul.f32 %v206_v39, %v203_v42  ;;  %v211_v47 = vmul.f32 %v207_v40, %v204_v44 }
 0x140   :  { %v217_v48 = vadd.f32 %v213_v43, %v210_v46  ;;  %v218_v49 = vadd.f32 %v214_v45, %v211_v47 }
 0x142   :  { %v219_v50 = vmax.f32 %v217_v48, 0.0  ;;  %v220_v51 = vmax.f32 %v218_v49, 0.0 }
 0x144   :  { %v221_v52 = vpack.c.bf16 %v219_v50, %v219_v50  ;;  %v222_v54 = vpack.c.bf16 %v220_v51, %v220_v51 }
 0x146   :  { %363 = vmatmul.bf16.vlgmr.msra.gmra.mxu2 %v221_v52  ;;  %376 = vmatmul.bf16.vlgmr.msra.gmra.mxu3 %v222_v54 }
 0x1c9   :  { %v364_v55 = vpop.f32.mrf.mxu2  ;;  %v377_v56 = vpop.f32.mrf.mxu3 }
 0x1ca   :  { %v365_v57 = vadd.f32 %v725_v53, %v364_v55 }
 0x1cc   :  { %v378_v58 = vadd.f32 %v377_v56, %v365_v57 }
 0x1ce   :  { %383 = vadd.xlane.f32.xlu1 %v378_v58  ;;  %v393_v61 = vmul.f32 %v378_v58, %v378_v58 }
 0x1d1   :  { %v366_v59 = vpop.f32.mrf.mxu2  ;;  %v379_v60 = vpop.f32.mrf.mxu3 }
 0x1d6   :  { %394 = vadd.xlane.f32.xlu1 %v393_v61 }
 0x241   :  { %v384_v9 = vpop.xlane.xlu1 %383 }
 0x242   :  { %v392_v13 = vmul.f32 %v391_v11, %v384_v9 }
 0x244   :  { %v397_v16 = vmul.f32 %v392_v13, %v392_v13  ;;  %v400_v27 = vsub.f32 %v378_v58, %v392_v13 }
 0x249   :  { %v395_v15 = vpop.xlane.xlu1 %394 }
 0x24a   :  { %v396_v17 = vmul.f32 %v395_v15, %v391_v11 }
 0x24c   :  { %v398_v18 = vsub.f32 %v396_v17, %v397_v16 }
 0x24e   :  { %v399_v19 = vmax.f32 %v398_v18, 0.0 }
 0x250   :  { %v401_v20 = vadd.f32 1e-05, %v399_v19 }
 0x252   :  { %735 = vrsqrt.f32 %v401_v20  ;;  %vm408_vm6 = vweird.f32 %v401_v20 }
 0x258   :  { %v736_v21 = vpop.eup %735 }
 0x259   :  { %v403_v22 = vmul.f32 %v736_v21, %v401_v20  ;;  %vm409_vm5 = vweird.f32 %v736_v21 }
 0x25a   :  { %vm410_vm7 = vmor %vm408_vm6, %vm409_vm5 }
 0x25b   :  { %v404_v23 = vmul.f32 %v736_v21, %v403_v22 }
 0x25d   :  { %v405_v24 = vmul.f32 0.5, %v404_v23 }
 0x25f   :  { %v406_v25 = vsub.f32 1.5, %v405_v24 }
 0x261   :  { %v407_v26 = vmul.f32 %v736_v21, %v406_v25 }
 0x263   :  { %v411_v29 = vsel %vm410_vm7, %v736_v21, %v407_v26 }
 0x264   :  { %v412_v30 = vmul.f32 %v411_v29, %v400_v27 }
 0x266   :  { %v416_v32 = vmul.f32 %v726_v28, %v412_v30 }
 0x268   :  { %v420_v33 = vadd.f32 %v727_v31, %v416_v32 }
 0x26a   :  { %v421_v34 = vmax.f32 %v420_v33, 0.0 }
 0x26c   :  { %v422_v35 = vpack.c.bf16 %v421_v34, %v421_v34 }
 0x26e   :  { %499 = vmatmul.bf16.vlgmr.msrb.gmra.mxu0 %v422_v35 }
 0x2eb   :  { %v500_v37 = vpop.f32.mrf.mxu0 }
 0x2ec   :  { %v501_v38 = vadd.f32 %v728_v36, %v500_v37 }
 0x2ee   :  { %737 = vtanh.f32 %v501_v38 }
 0x2f3   :  { %v502_v39 = vpop.f32.mrf.mxu0 }
 0x2f4   :  { %v738_v40 = vpop.eup %737 }
 0x2f5   :  { %505 = vst [vmem:[#allocation2] sm:$0xff] %v738_v40 }
 0x2f6   :  { %516 = dma.vmem_to_hbm [thread:$0]  %s512_s7, 128, %s514_s3, [#allocation3]  }
 0x2f7   :  { %763 = dma.done.wait [#allocation3], 128  }
 0x2f8   :  { %764 = vsyncadd [#allocation3], 4294967168 }
 0x2f9   :  { %521 = vsyncpa [#allocation3], 1 }

</bundles_post_ra>
